<compile_context>
chip_gen: v5e
topology: v5e:2x2
jax: 0.10.0
libtpu: 0.0.40
codegen_flags: <defaults>
</compile_context>

<pallas_src>
import jax
import jax.numpy as jnp
from jax.experimental import pallas as pl
from jax.experimental.pallas import tpu as pltpu


_VMEM_LIMIT_BYTES = 48 * 1024 * 1024  # headroom on v7x (64 MiB physical per TC)


def _round_up(x, m):
    return ((x + m - 1) // m) * m


def _pick_tile(n, candidates):
    """Largest candidate tile that divides n (n is padded so one always does)."""
    for c in candidates:
        if c <= n and n % c == 0:
            return c
    return n


# ---------------------------------------------------------------------------
# Kernel 1: XW_s = (X @ W) * d_src        (row-tiled over nodes)
# ---------------------------------------------------------------------------
def _scaled_xw_kernel(x_ref, w_ref, s_ref, o_ref):
    xw = jnp.dot(x_ref[...], w_ref[...], preferred_element_type=jnp.float32)
    o_ref[...] = (xw * s_ref[...]).astype(o_ref.dtype)


def _scaled_xw(x_pad, w_pad, d_src_pad):
    n_pad, c_in_pad = x_pad.shape
    c_out_pad = w_pad.shape[1]
    tr = _pick_tile(n_pad, (512, 256, 128))
    grid = (n_pad // tr,)
    return pl.pallas_call(
        _scaled_xw_kernel,
        out_shape=jax.ShapeDtypeStruct((n_pad, c_out_pad), jnp.bfloat16),
        grid=grid,
        in_specs=[
            pl.BlockSpec((tr, c_in_pad), lambda i: (i, 0)),
            pl.BlockSpec((c_in_pad, c_out_pad), lambda i: (0, 0)),
            pl.BlockSpec((tr, 1), lambda i: (i, 0)),
        ],
        out_specs=pl.BlockSpec((tr, c_out_pad), lambda i: (i, 0)),
        compiler_params=pltpu.CompilerParams(
            dimension_semantics=("parallel",),
            vmem_limit_bytes=_VMEM_LIMIT_BYTES,
        ),
    )(x_pad, w_pad, d_src_pad)


# ---------------------------------------------------------------------------
# Kernel 2: out = relu(d_dst * (A @ XW_s) + b)     (tiled over dst x src)
# ---------------------------------------------------------------------------
def _propagate_kernel(a_ref, xw_ref, d_ref, b_ref, o_ref, acc_ref):
    k = pl.program_id(1)

    @pl.when(k == 0)
    def _():
        acc_ref[...] = jnp.zeros_like(acc_ref)

    # bf16 x bf16 -> f32 accumulation on the MXU
    acc_ref[...] += jnp.dot(a_ref[...], xw_ref[...],
                            preferred_element_type=jnp.float32)

    @pl.when(k == pl.num_programs(1) - 1)
    def _():
        out = acc_ref[...] * d_ref[...] + b_ref[...]
        o_ref[...] = jnp.maximum(out, 0.0).astype(o_ref.dtype)


def _propagate(a_pad, xw, d_dst_pad, b_pad):
    n_pad = a_pad.shape[0]
    c_out_pad = xw.shape[1]
    tm = _pick_tile(n_pad, (256, 128))        # dst tile (sublane axis, mult of 8)
    tk = _pick_tile(n_pad, (512, 256, 128))   # src tile (lane axis, mult of 128)
    grid = (n_pad // tm, n_pad // tk)
    return pl.pallas_call(
        _propagate_kernel,
        out_shape=jax.ShapeDtypeStruct((n_pad, c_out_pad), jnp.float32),
        grid=grid,
        in_specs=[
            pl.BlockSpec((tm, tk), lambda i, k: (i, k)),
            pl.BlockSpec((tk, c_out_pad), lambda i, k: (k, 0)),
            pl.BlockSpec((tm, 1), lambda i, k: (i, 0)),
            pl.BlockSpec((1, c_out_pad), lambda i, k: (0, 0)),
        ],
        out_specs=pl.BlockSpec((tm, c_out_pad), lambda i, k: (i, 0)),
        scratch_shapes=[pltpu.VMEM((tm, c_out_pad), jnp.float32)],
        compiler_params=pltpu.CompilerParams(
            dimension_semantics=("parallel", "arbitrary"),
            vmem_limit_bytes=_VMEM_LIMIT_BYTES,
        ),
    )(a_pad, xw, d_dst_pad, b_pad)


# ---------------------------------------------------------------------------
# One GCN layer on padded activations
# ---------------------------------------------------------------------------
def gcn_layer_padded(a, x_pad, w, b, *, n_pad):
    """relu(gcn_norm(A) @ (X @ W) + b) on zero-padded node/channel dims."""
    n_dst, n_src = a.shape
    c_in, c_out = w.shape
    c_in_pad = x_pad.shape[1]
    c_out_pad = _round_up(c_out, 128)
    assert c_in_pad >= c_in and x_pad.shape[0] == n_pad

    # --- gcn_norm degree vectors (tiny, plain XLA) -------------------------
    a32 = a.astype(jnp.float32)
    deg = jnp.sum(a32, axis=1)                                   # row degrees
    d_dst = jnp.where(deg > 0.0, jax.lax.rsqrt(deg), 0.0)
    col = d_dst @ a32                                            # colsum of row-scaled A
    d_src = jnp.where(col > 0.0, jax.lax.rsqrt(col), 0.0)

    d_dst_pad = jnp.pad(d_dst, (0, n_pad - n_dst)).reshape(n_pad, 1)
    d_src_pad = jnp.pad(d_src, (0, n_pad - n_src)).reshape(n_pad, 1)

    # --- pad operands (A is 0/1 -> exact in bf16) ---------------------------
    a_pad = jnp.pad(a.astype(jnp.bfloat16),
                    ((0, n_pad - n_dst), (0, n_pad - n_src)))
    w_pad = jnp.pad(w, ((0, c_in_pad - c_in), (0, c_out_pad - c_out)))
    b_pad = jnp.pad(b, (0, c_out_pad - c_out)).reshape(1, c_out_pad)

    # --- two fused Pallas kernels -------------------------------------------
    xw = _scaled_xw(x_pad, w_pad, d_src_pad)            # [n_pad, c_out_pad] bf16
    out = _propagate(a_pad, xw, d_dst_pad, b_pad)       # [n_pad, c_out_pad] f32
    return out


def init_gcn_params(key, in_channels, hidden_channels, out_channels, num_layers):
    """Glorot-style init for each GCNConv layer: W [Cin,Cout], b [Cout]."""
    dims = [in_channels] + [hidden_channels] * (num_layers - 1) + [out_channels]
    params = []
    for i in range(num_layers):
        key, wk = jax.random.split(key)
        cin, cout = dims[i], dims[i + 1]
        scale = jnp.sqrt(6.0 / (cin + cout))
        w = jax.random.uniform(wk, (cin, cout), jnp.float32, -scale, scale)
        b = jnp.zeros((cout,), jnp.float32)
        params.append((w, b))
    return params


def gcn_forward(x, adjs, params):
    """Mirrors GCN.forward: per-layer [dropout ->] gcn_norm -> GCNConv -> activation."""
    n, c_in = x.shape
    n_pad = _round_up(max(n, 1), 128)
    c_in_pad = _round_up(c_in, 128)
    x_pad = jnp.pad(x, ((0, n_pad - n), (0, c_in_pad - c_in)))

    out_c = c_in
    for i, a in enumerate(adjs):
        if i != 0:
            pass  # dropout: identity in eval mode
        w, b = params[i]
        x_pad = gcn_layer_padded(a, x_pad, w, b, n_pad=n_pad)
        out_c = w.shape[1]
    return x_pad[:n, :out_c]


if __name__ == "__main__":
    key = jax.random.PRNGKey(0)

    # Small synthetic sizes
    N = 32               # nodes
    in_channels = 16
    hidden_channels = 32
    out_channels = 8
    num_layers = 3

    key, xk = jax.random.split(key)
    x = jax.random.normal(xk, (N, in_channels), jnp.float32)

    # Synthetic per-layer adjacencies (dense 0/1 matrices, edge value 1.0)
    adjs = []
    for _ in range(num_layers):
        key, ak = jax.random.split(key)
        a = (jax.random.uniform(ak, (N, N)) < 0.2).astype(jnp.float32)
        adjs.append(a)

    key, pk = jax.random.split(key)
    params = init_gcn_params(pk, in_channels, hidden_channels, out_channels, num_layers)

    out = gcn_forward(x, adjs, params)
    jax.block_until_ready(out)
    assert out.shape == (N, out_channels)
    print("KERNEL_OK")
</pallas_src>

<mosaic_0001>
module attributes {stable_mosaic.version = 11 : i64} {
  func.func @_scaled_xw_kernel(%arg0: i32, %arg1: memref<128x128xf32, #tpu.memory_space<vmem>>, %arg2: memref<128x128xf32, #tpu.memory_space<vmem>>, %arg3: memref<128x1xf32, #tpu.memory_space<vmem>>, %arg4: memref<128x128xbf16, #tpu.memory_space<vmem>>) attributes {dimension_semantics = [#tpu.dimension_semantics<parallel>], iteration_bounds = array<i64: 1>, scalar_prefetch = 0 : i64, scratch_operands = 0 : i64, tpu.core_type = #tpu.core_type<tc>, window_params = [{transform_indices = @transform_0, window_bounds = array<i64: 128, 128>}, {pipeline_mode = #tpu.pipeline_mode<synchronous>, transform_indices = @transform_1, window_bounds = array<i64: 128, 128>}, {transform_indices = @transform_2, window_bounds = array<i64: 128, 1>}, {transform_indices = @transform_3, window_bounds = array<i64: 128, 128>}]} {
    %c0 = arith.constant 0 : index
    %c0_0 = arith.constant 0 : index
    %0 = vector.load %arg1[%c0, %c0_0] : memref<128x128xf32, #tpu.memory_space<vmem>>, vector<128x128xf32>
    %c0_1 = arith.constant 0 : index
    %c0_2 = arith.constant 0 : index
    %1 = vector.load %arg2[%c0_1, %c0_2] : memref<128x128xf32, #tpu.memory_space<vmem>>, vector<128x128xf32>
    %cst = arith.constant dense<0.000000e+00> : vector<128x128xf32>
    %2 = tpu.matmul %0, %1, %cst {dimension_numbers = #tpu.dot_dimension_numbers<[1], [0], [0], [1], [0, 0, 1, 1], [], []>} : vector<128x128xf32>, vector<128x128xf32>, vector<128x128xf32> -> vector<128x128xf32>
    %c0_3 = arith.constant 0 : index
    %c0_4 = arith.constant 0 : index
    %3 = vector.load %arg3[%c0_3, %c0_4] : memref<128x1xf32, #tpu.memory_space<vmem>>, vector<128x1xf32>
    %4 = vector.broadcast %3 : vector<128x1xf32> to vector<128x128xf32>
    %5 = arith.mulf %2, %4 : vector<128x128xf32>
    %6 = arith.truncf %5 : vector<128x128xf32> to vector<128x128xbf16>
    %c0_5 = arith.constant 0 : index
    %c0_6 = arith.constant 0 : index
    %7 = vector.load %arg4[%c0_5, %c0_6] : memref<128x128xbf16, #tpu.memory_space<vmem>>, vector<128x128xbf16>
    tpu.vector_store %arg4[%c0_5, %c0_6], %6 {strides = array<i32>} : memref<128x128xbf16, #tpu.memory_space<vmem>>, vector<128x128xbf16>,
    return
  }
  func.func @transform_0(%arg0: i32) -> (i32, i32) {
    %c0_i32 = arith.constant 0 : i32
    %c0_i32_0 = arith.constant 0 : i32
    return %arg0, %c0_i32 : i32, i32
  }
  func.func @transform_1(%arg0: i32) -> (i32, i32) {
    %c0_i32 = arith.constant 0 : i32
    %c0_i32_0 = arith.constant 0 : i32
    %c0_i32_1 = arith.constant 0 : i32
    return %c0_i32, %c0_i32_0 : i32, i32
  }
  func.func @transform_2(%arg0: i32) -> (i32, i32) {
    %c0_i32 = arith.constant 0 : i32
    %c0_i32_0 = arith.constant 0 : i32
    return %arg0, %c0_i32 : i32, i32
  }
  func.func @transform_3(%arg0: i32) -> (i32, i32) {
    %c0_i32 = arith.constant 0 : i32
    %c0_i32_0 = arith.constant 0 : i32
    return %arg0, %c0_i32 : i32, i32
  }
}

</mosaic_0001>

<bundles_post_ra>
// kernel: tpu_custom_call.1
= control target key start
LH: loop header
LB: loop body
LE: loop exit
PB: predicated region body
PF: predicated region fallthrough
CT: control target
= control target key end

     0   :  { %8 = vsyncpa [#allocation3], 0  ;;  %s577_s0 = inlined_call_operand.vmem [shape: f32[128,128], index: 0, kind: input, shape index: {}]   ;;  %s578_s1 = inlined_call_operand.hbm [shape: f32[128,128], index: 1, kind: input, shape index: {}]   ;;  %s579_s2 = inlined_call_operand.vmem [shape: f32[128,1], index: 2, kind: input, shape index: {}]   ;;  %s580_s3 = inlined_call_operand.hbm [shape: bf16[128,128], index: 3, kind: output, shape index: {}]  }
   0x1   :  { %9 = vsyncpa [#allocation4], 0  ;;  %s16_s14 = sshll.u32 %s578_s1, 4  ;;  %s448_s15 = smov [#allocation2]   ;;  %s17_s14 = int_to_ptr.hbm [resolvable:$true] %s16_s14 }
   0x2   :  { %s18_s16 = sshll.u32 %s448_s15, 4  ;;  %s449_s17 = smov 128   ;;  %s19_s16 = int_to_ptr.vmem [resolvable:$true] %s18_s16 }
   0x3   :  { %s450_s18 = smov 8  }
   0x4   :  { %24 = dma.hbm_to_vmem [thread:$0]  %s17_s14, 2048, %s19_s16, [#allocation3], %s449_s17, %s449_s17, %s450_s18  }
   0x5   :  { %444 = dma.done.wait [#allocation3], 2048  }
   0x6   :  { %445 = vsyncadd [#allocation3], 4294965248  ;;  %v451_v0 = vmov 0   ;;  %v128_v1 = vld [vmem:[%s579_s2] sm:$0xff]  ;;  %v62_v2 = vld [vmem:[#allocation2 + $0x78] sm:$0xff]  ;;  %s278_s28 = sshll.u32 %s580_s3, 4  ;;  %s279_s28 = int_to_ptr.hbm [resolvable:$true] %s278_s28 }
   0x7   :  { %393 = vset.pattern.permute.xlu0 %v451_v0  ;;  %394 = vset.pattern.permute.xlu1 %v451_v0  ;;  %v61_v3 = vld [vmem:[#allocation2 + $0x70] sm:$0xff]  ;;  %v60_v4 = vld [vmem:[#allocation2 + $0x68] sm:$0xff]  ;;  %v59_v5 = vld [vmem:[#allocation2 + $0x60] sm:$0xff]  ;;  %s453_s29 = smov 64   ;;  %s454_s30 = smov 4  }
   0x8   :  { %395 = vset.pattern.permute.xlu2 %v451_v0  ;;  %146 = vperm.xlu0 %393, %v128_v1   ;;  %v130_v6 = vld [vmem:[%s579_s2 + $0x10] sm:$0xff]  ;;  %v129_v7 = vld [vmem:[%s579_s2 + $0x8] sm:$0xff]  ;;  %v58_v8 = vld [vmem:[#allocation2 + $0x58] sm:$0xff] }
   0x9   :  { %63 = vmatpush.msra.mxu0 %v62_v2  ;;  %338 = vmatpush.msra.mxu1 %v62_v2  ;;  %v57_v9 = vld [vmem:[#allocation2 + $0x50] sm:$0xff]  ;;  %v56_v10 = vld [vmem:[#allocation2 + $0x48] sm:$0xff]  ;;  %v55_v11 = vld [vmem:[#allocation2 + $0x40] sm:$0xff] }
   0xa   :  { %339 = vmatpush.msra.mxu2 %v62_v2  ;;  %340 = vmatpush.msra.mxu3 %v62_v2  ;;  %v131_v12 = vld [vmem:[%s579_s2 + $0x18] sm:$0xff]  ;;  %v134_v13 = vld [vmem:[%s579_s2 + $0x30] sm:$0xff]  ;;  %v52_v16 = vld [vmem:[#allocation2 + $0x28] sm:$0xff] }
   0xb   :  { %64 = vmatpush.msra.mxu0 %v61_v3  ;;  %341 = vmatpush.msra.mxu1 %v61_v3  ;;  %v54_v14 = vld [vmem:[#allocation2 + $0x38] sm:$0xff]  ;;  %v53_v15 = vld [vmem:[#allocation2 + $0x30] sm:$0xff]  ;;  %v51_v17 = vld [vmem:[#allocation2 + $0x20] sm:$0xff] }
   0xc   :  { %342 = vmatpush.msra.mxu2 %v61_v3  ;;  %343 = vmatpush.msra.mxu3 %v61_v3  ;;  %v135_v18 = vld [vmem:[%s579_s2 + $0x38] sm:$0xff]  ;;  %v137_v19 = vld [vmem:[%s579_s2 + $0x48] sm:$0xff]  ;;  %v49_v21 = vld [vmem:[#allocation2 + $0x10] sm:$0xff] }
   0xd   :  { %65 = vmatpush.msra.mxu0 %v60_v4  ;;  %344 = vmatpush.msra.mxu1 %v60_v4  ;;  %v50_v20 = vld [vmem:[#allocation2 + $0x18] sm:$0xff]  ;;  %v48_v22 = vld [vmem:[#allocation2 + $0x8] sm:$0xff]  ;;  %v47_v23 = vld [vmem:[#allocation2] sm:$0xff] }
   0xe   :  { %345 = vmatpush.msra.mxu2 %v60_v4  ;;  %346 = vmatpush.msra.mxu3 %v60_v4  ;;  %v31_v24 = vld [vmem:[%s577_s0] sm:$0xff]  ;;  %v138_v29 = vld [vmem:[%s579_s2 + $0x50] sm:$0xff]  ;;  %v32_v31 = vld [vmem:[%s577_s0 + $0x8] sm:$0xff] }
   0xf   :  { %66 = vmatpush.msra.mxu0 %v59_v5  ;;  %347 = vmatpush.msra.mxu1 %v59_v5  ;;  %v35_v25 = vld [vmem:[%s577_s0 + $0x20] sm:$0xff]  ;;  %v36_v32 = vld [vmem:[%s577_s0 + $0x28] sm:$0xff]  ;;  %v143_v37 = vld [vmem:[%s579_s2 + $0x78] sm:$0xff] }
  0x10   :  { %348 = vmatpush.msra.mxu2 %v59_v5  ;;  %349 = vmatpush.msra.mxu3 %v59_v5  ;;  %v39_v26 = vld [vmem:[%s577_s0 + $0x40] sm:$0xff]  ;;  %v40_v33 = vld [vmem:[%s577_s0 + $0x48] sm:$0xff]  ;;  %v33_v38 = vld [vmem:[%s577_s0 + $0x10] sm:$0xff] }
  0x11   :  { %156 = vperm.xlu1 %394, %v130_v6   ;;  %151 = vperm.xlu0 %393, %v129_v7   ;;  %v43_v27 = vld [vmem:[%s577_s0 + $0x60] sm:$0xff]  ;;  %v44_v34 = vld [vmem:[%s577_s0 + $0x68] sm:$0xff]  ;;  %v37_v39 = vld [vmem:[%s577_s0 + $0x30] sm:$0xff] }
  0x12   :  { %67 = vmatpush.msra.mxu0 %v58_v8  ;;  %350 = vmatpush.msra.mxu1 %v58_v8  ;;  %v132_v28 = vld [vmem:[%s579_s2 + $0x20] sm:$0xff]  ;;  %v133_v35 = vld [vmem:[%s579_s2 + $0x28] sm:$0xff]  ;;  %v41_v40 = vld [vmem:[%s577_s0 + $0x50] sm:$0xff] }
  0x13   :  { %351 = vmatpush.msra.mxu2 %v58_v8  ;;  %352 = vmatpush.msra.mxu3 %v58_v8  ;;  %v140_v30 = vld [vmem:[%s579_s2 + $0x60] sm:$0xff]  ;;  %v141_v36 = vld [vmem:[%s579_s2 + $0x68] sm:$0xff]  ;;  %v45_v41 = vld [vmem:[%s577_s0 + $0x70] sm:$0xff] }
  0x14   :  { %68 = vmatpush.msra.mxu0 %v57_v9  ;;  %353 = vmatpush.msra.mxu1 %v57_v9  ;;  %v136_v42 = vld [vmem:[%s579_s2 + $0x40] sm:$0xff]  ;;  %v34_v43 = vld [vmem:[%s577_s0 + $0x18] sm:$0xff]  ;;  %v142_v48 = vld [vmem:[%s579_s2 + $0x70] sm:$0xff] }
  0x15   :  { %354 = vmatpush.msra.mxu2 %v57_v9  ;;  %355 = vmatpush.msra.mxu3 %v57_v9  ;;  %v38_v44 = vld [vmem:[%s577_s0 + $0x38] sm:$0xff] }
  0x16   :  { %69 = vmatpush.msra.mxu0 %v56_v10  ;;  %356 = vmatpush.msra.mxu1 %v56_v10  ;;  %v42_v45 = vld [vmem:[%s577_s0 + $0x58] sm:$0xff] }
  0x17   :  { %357 = vmatpush.msra.mxu2 %v56_v10  ;;  %358 = vmatpush.msra.mxu3 %v56_v10  ;;  %v46_v46 = vld [vmem:[%s577_s0 + $0x78] sm:$0xff]  ;;  %s452_s0 = smov [#allocation5]  }
  0x18   :  { %70 = vmatpush.msra.mxu0 %v55_v11  ;;  %359 = vmatpush.msra.mxu1 %v55_v11  ;;  %v139_v47 = vld [vmem:[%s579_s2 + $0x58] sm:$0xff]  ;;  %s276_s2 = sshll.u32 %s452_s0, 4  ;;  %s277_s2 = int_to_ptr.vmem [resolvable:$true] %s276_s2 }
  0x19   :  { %360 = vmatpush.msra.mxu2 %v55_v11  ;;  %361 = vmatpush.msra.mxu3 %v55_v11 }
  0x1a   :  { %161 = vperm.xlu1 %394, %v131_v12   ;;  %176 = vperm.xlu0 %393, %v134_v13  }
  0x1b   :  { %71 = vmatpush.msra.mxu0 %v54_v14  ;;  %362 = vmatpush.msra.mxu1 %v54_v14 }
  0x1c   :  { %363 = vmatpush.msra.mxu2 %v54_v14  ;;  %364 = vmatpush.msra.mxu3 %v54_v14 }
  0x1d   :  { %72 = vmatpush.msra.mxu0 %v53_v15  ;;  %365 = vmatpush.msra.mxu1 %v53_v15 }
  0x1e   :  { %366 = vmatpush.msra.mxu2 %v53_v15  ;;  %367 = vmatpush.msra.mxu3 %v53_v15 }
  0x1f   :  { %73 = vmatpush.msra.mxu0 %v52_v16  ;;  %368 = vmatpush.msra.mxu1 %v52_v16 }
  0x20   :  { %369 = vmatpush.msra.mxu2 %v52_v16  ;;  %370 = vmatpush.msra.mxu3 %v52_v16 }
  0x21   :  { %74 = vmatpush.msra.mxu0 %v51_v17  ;;  %371 = vmatpush.msra.mxu1 %v51_v17 }
  0x22   :  { %372 = vmatpush.msra.mxu2 %v51_v17  ;;  %373 = vmatpush.msra.mxu3 %v51_v17 }
  0x23   :  { %181 = vperm.xlu1 %394, %v135_v18   ;;  %191 = vperm.xlu0 %393, %v137_v19  }
  0x24   :  { %75 = vmatpush.msra.mxu0 %v50_v20  ;;  %374 = vmatpush.msra.mxu1 %v50_v20 }
  0x25   :  { %375 = vmatpush.msra.mxu2 %v50_v20  ;;  %376 = vmatpush.msra.mxu3 %v50_v20 }
  0x26   :  { %76 = vmatpush.msra.mxu0 %v49_v21  ;;  %377 = vmatpush.msra.mxu1 %v49_v21 }
  0x27   :  { %378 = vmatpush.msra.mxu2 %v49_v21  ;;  %379 = vmatpush.msra.mxu3 %v49_v21 }
  0x28   :  { %77 = vmatpush.msra.mxu0 %v48_v22  ;;  %380 = vmatpush.msra.mxu1 %v48_v22 }
  0x29   :  { %381 = vmatpush.msra.mxu2 %v48_v22  ;;  %382 = vmatpush.msra.mxu3 %v48_v22 }
  0x2a   :  { %78 = vmatpush.msra.mxu0 %v47_v23  ;;  %383 = vmatpush.msra.mxu1 %v47_v23 }
  0x2b   :  { %384 = vmatpush.msra.mxu2 %v47_v23  ;;  %385 = vmatpush.msra.mxu3 %v47_v23 }
  0x2c   :  { %79 = vmatmul.f32.vlgmr.msra.gmra.mxu0 %v31_v24  ;;  %91 = vmatmul.f32.vlgmr.msra.gmra.mxu1 %v35_v25 }
  0x2d   :  { %103 = vmatmul.f32.vlgmr.msra.gmra.mxu2 %v39_v26  ;;  %115 = vmatmul.f32.vlgmr.msra.gmra.mxu3 %v43_v27 }
  0x2e   :  { %166 = vperm.xlu2 %395, %v132_v28   ;;  %196 = vperm.xlu1 %394, %v138_v29  }
  0x2f   :  { %206 = vperm.xlu0 %393, %v140_v30  }
  0x34   :  { %82 = vmatmul.f32.gmra.mxu0 %v32_v31  ;;  %94 = vmatmul.f32.gmra.mxu1 %v36_v32 }
  0x35   :  { %106 = vmatmul.f32.gmra.mxu2 %v40_v33  ;;  %118 = vmatmul.f32.gmra.mxu3 %v44_v34 }
  0x36   :  { %171 = vperm.xlu2 %395, %v133_v35   ;;  %211 = vperm.xlu1 %394, %v141_v36  }
  0x37   :  { %221 = vperm.xlu0 %393, %v143_v37  }
  0x3c   :  { %85 = vmatmul.f32.gmra.mxu0 %v33_v38  ;;  %97 = vmatmul.f32.gmra.mxu1 %v37_v39 }
  0x3d   :  { %109 = vmatmul.f32.gmra.mxu2 %v41_v40  ;;  %121 = vmatmul.f32.gmra.mxu3 %v45_v41 }
  0x3e   :  { %186 = vperm.xlu2 %395, %v136_v42  }
  0x44   :  { %88 = vmatmul.f32.gmra.mxu0 %v34_v43  ;;  %100 = vmatmul.f32.gmra.mxu1 %v38_v44 }
  0x45   :  { %112 = vmatmul.f32.gmra.mxu2 %v42_v45  ;;  %124 = vmatmul.f32.gmra.mxu3 %v46_v46 }
  0x46   :  { %201 = vperm.xlu2 %395, %v139_v47  }
  0x4e   :  { %216 = vperm.xlu2 %395, %v142_v48  }
  0x7a   :  { %v147_v49 = vpop.permute.xlu0 %146 }
  0x83   :  { %v157_v50 = vpop.permute.xlu1 %156  ;;  %v152_v51 = vpop.permute.xlu0 %151 }
  0x88   :  { %v167_v53 = vpop.permute.xlu2 %166 }
  0x8c   :  { %v162_v52 = vpop.permute.xlu1 %161  ;;  %v177_v54 = vpop.permute.xlu0 %176 }
  0x90   :  { %v172_v56 = vpop.permute.xlu2 %171 }
  0x95   :  { %v182_v55 = vpop.permute.xlu1 %181  ;;  %v192_v59 = vpop.permute.xlu0 %191 }
  0x98   :  { %v187_v5 = vpop.permute.xlu2 %186 }
  0xa0   :  { %v197_v60 = vpop.permute.xlu1 %196  ;;  %v202_v20 = vpop.permute.xlu2 %201 }
  0xa1   :  { %v207_v8 = vpop.permute.xlu0 %206 }
  0xa8   :  { %v212_v10 = vpop.permute.xlu1 %211  ;;  %v217_v31 = vpop.permute.xlu2 %216 }
  0xa9   :  { %v80_v57 = vpop.f32.mrf.mxu0  ;;  %v92_v58 = vpop.f32.mrf.mxu1 }
  0xaa   :  { %v224_v1 = vmul.f32 %v147_v49, %v80_v57  ;;  %v228_v2 = vmul.f32 %v167_v53, %v92_v58  ;;  %v222_v33 = vpop.permute.xlu0 %221 }
  0xb0   :  { %v104_v61 = vpop.f32.mrf.mxu2  ;;  %v116_v62 = vpop.f32.mrf.mxu3 }
  0xb1   :  { %v83_v63 = vpop.f32.mrf.mxu0  ;;  %v95_v0 = vpop.f32.mrf.mxu1  ;;  %v232_v11 = vmul.f32 %v187_v5, %v104_v61  ;;  %v236_v14 = vmul.f32 %v207_v8, %v116_v62 }
  0xb2   :  { %v225_v3 = vmul.f32 %v152_v51, %v83_v63  ;;  %v229_v4 = vmul.f32 %v172_v56, %v95_v0 }
  0xb4   :  { %v294_v6 = vpack.c.bf16 %v225_v3, %v224_v1  ;;  %v304_v7 = vpack.c.bf16 %v229_v4, %v228_v2 }
  0xb6   :  { %295 = vst [vmem:[#allocation5] sm:$0xff] %v294_v6  }
  0xb7   :  { %332 = vst [vmem:[#allocation5 + $0x10] sm:$0xff] %v304_v7  }
  0xb8   :  { %v107_v9 = vpop.f32.mrf.mxu2  ;;  %v119_v13 = vpop.f32.mrf.mxu3 }
  0xb9   :  { %v233_v12 = vmul.f32 %v192_v59, %v107_v9  ;;  %v237_v15 = vmul.f32 %v212_v10, %v119_v13  ;;  %v86_v16 = vpop.f32.mrf.mxu0  ;;  %v98_v17 = vpop.f32.mrf.mxu1 }
  0xba   :  { %v226_v25 = vmul.f32 %v157_v50, %v86_v16  ;;  %v230_v26 = vmul.f32 %v177_v54, %v98_v17 }
  0xbb   :  { %v314_v18 = vpack.c.bf16 %v233_v12, %v232_v11  ;;  %v324_v19 = vpack.c.bf16 %v237_v15, %v236_v14 }
  0xbd   :  { %334 = vst [vmem:[#allocation5 + $0x20] sm:$0xff] %v314_v18  }
  0xbe   :  { %336 = vst [vmem:[#allocation5 + $0x30] sm:$0xff] %v324_v19  }
  0xc0   :  { %v110_v21 = vpop.f32.mrf.mxu2  ;;  %v122_v22 = vpop.f32.mrf.mxu3 }
  0xc1   :  { %v89_v23 = vpop.f32.mrf.mxu0  ;;  %v101_v24 = vpop.f32.mrf.mxu1  ;;  %v234_v34 = vmul.f32 %v197_v60, %v110_v21  ;;  %v238_v37 = vmul.f32 %v217_v31, %v122_v22 }
  0xc2   :  { %v227_v27 = vmul.f32 %v162_v52, %v89_v23  ;;  %v231_v28 = vmul.f32 %v182_v55, %v101_v24 }
  0xc4   :  { %v299_v29 = vpack.c.bf16 %v227_v27, %v226_v25  ;;  %v309_v30 = vpack.c.bf16 %v231_v28, %v230_v26 }
  0xc6   :  { %331 = vst [vmem:[#allocation5 + $0x8] sm:$0xff] %v299_v29  }
  0xc7   :  { %333 = vst [vmem:[#allocation5 + $0x18] sm:$0xff] %v309_v30  }
  0xc8   :  { %v113_v32 = vpop.f32.mrf.mxu2  ;;  %v125_v36 = vpop.f32.mrf.mxu3 }
  0xc9   :  { %v235_v35 = vmul.f32 %v202_v20, %v113_v32  ;;  %v239_v38 = vmul.f32 %v222_v33, %v125_v36 }
  0xcb   :  { %v319_v39 = vpack.c.bf16 %v235_v35, %v234_v34  ;;  %v329_v40 = vpack.c.bf16 %v239_v38, %v238_v37 }
  0xcd   :  { %335 = vst [vmem:[#allocation5 + $0x28] sm:$0xff] %v319_v39  }
  0xce   :  { %337 = vst [vmem:[#allocation5 + $0x38] sm:$0xff] %v329_v40  }
  0xcf   :  { %284 = dma.vmem_to_hbm [thread:$0]  %s277_s2, 1024, %s279_s28, [#allocation4], %s453_s29, %s453_s29, %s454_s30  }
  0xd0   :  { %446 = dma.done.wait [#allocation4], 1024  }
  0xd1   :  { %447 = vsyncadd [#allocation4], 4294966272 }
  0xd2   :  { %289 = vsyncpa [#allocation3], 1 }
  0xd3   :  { %290 = vsyncpa [#allocation4], 1 }

</bundles_post_ra>
